<compile_context>
chip_gen: v6e
topology: v6e:2x2x1
jax: 0.10.0
libtpu: 0.0.40
codegen_flags: <defaults>
</compile_context>

<pallas_src>
import functools

import jax
import jax.numpy as jnp
from jax import lax
from jax.experimental import pallas as pl
from jax.experimental.pallas import tpu as pltpu

LOG_SIG_MIN = -20.0
LOG_SIG_MAX = 2.0
_LANES = 128      # padded lane width of hidden activations / weight-slab columns
_ROW_ALIGN = 16   # slab row alignment: relayout-free row slices for bf16 and f32
_TB_MAX = 2048    # max batch-tile rows (per-step compute >> ~0.35us grid-step overhead)


def _round_up(x, m):
    return ((x + m - 1) // m) * m


def _choose_batch_tiling(batch):
    """Pick (TB, B_pad): TB % 8 == 0, minimal row padding, and >= 2 grid steps once
    the batch is big enough that splitting across v7x's two TensorCores pays."""
    n_tiles = max(1, -(-batch // _TB_MAX))
    if n_tiles == 1 and batch > 1024:
        n_tiles = 2
    tb = _round_up(-(-batch // n_tiles), 8)
    return tb, tb * n_tiles


def _make_kernel(g_pad, s_pad, action_dim, compute_dtype):
    """Fused kernel with static 16-aligned sublane offsets into the weight slab."""
    two_a = 2 * action_dim
    o_enc = 0                       # (g_pad, 128)  W_enc            (zero-padded)
    o_w1s = o_enc + g_pad           # (s_pad, 128)  W1[:state_dim]
    o_w1e = o_w1s + s_pad           # (128,   128)  W1[state_dim:]   (rows >= encode_dim zero)
    o_w2 = o_w1e + _LANES           # (128,   128)  W2               (rows >= hidden zero)
    o_hd = o_w2 + _LANES            # (128,   128)  [Wm | Wl]        (rows >= hidden zero)

    def kernel(state_ref, gmm_ref, w_ref, b_ref, out_ref):
        f32 = jnp.float32
        x_s = state_ref[...].astype(compute_dtype)       # (TB, s_pad)
        x_g = gmm_ref[...].astype(compute_dtype)         # (TB, g_pad)

        # encoded_gmm = relu(gmm @ W_enc + b_enc); lanes >= encode_dim stay exactly 0.
        enc = jnp.dot(x_g, w_ref[o_enc:o_enc + g_pad, :], preferred_element_type=f32)
        enc = jnp.maximum(enc + b_ref[0:1, :], 0.0)      # (TB, 128) f32

        # h1 = relu(concat([state, enc]) @ W1 + b1) == relu(state@W1s + enc@W1e + b1)
        h1 = (jnp.dot(x_s, w_ref[o_w1s:o_w1s + s_pad, :], preferred_element_type=f32)
              + jnp.dot(enc.astype(compute_dtype), w_ref[o_w1e:o_w1e + _LANES, :],
                        preferred_element_type=f32)
              + b_ref[1:2, :])
        h1 = jnp.maximum(h1, 0.0)                        # (TB, 128) f32

        # h2 = relu(h1 @ W2 + b2)
        h2 = jnp.dot(h1.astype(compute_dtype), w_ref[o_w2:o_w2 + _LANES, :],
                     preferred_element_type=f32) + b_ref[2:3, :]
        h2 = jnp.maximum(h2, 0.0)                        # (TB, 128) f32

        # fused heads: lanes [0, A) = mean, lanes [A, 2A) = log_std, lanes >= 2A stay 0.
        heads = jnp.dot(h2.astype(compute_dtype), w_ref[o_hd:o_hd + _LANES, :],
                        preferred_element_type=f32) + b_ref[3:4, :]

        # clip only the log_std lane-half
        lane = lax.broadcasted_iota(jnp.int32, heads.shape, 1)
        is_log = (lane >= action_dim) & (lane < two_a)
        heads = jnp.where(is_log, jnp.clip(heads, LOG_SIG_MIN, LOG_SIG_MAX), heads)

        # lane-dense (TB, 128) store; wrapper slices the mean / log_std halves.
        out_ref[...] = heads.astype(out_ref.dtype)

    return kernel


def pack_policy_params(params, *, use_bf16=True):
    """One-time packing of all weights into one slab and all biases into another.

    Call this once (outside the rollout/training hot path); pass the returned
    slabs to policy_forward.  Weight slab is bf16 by default (MXU fast path with
    f32 accumulation); set use_bf16=False for exact f32 parity.
    """
    gmm_dim, encode_dim = params["w_enc"].shape
    in_dim, hidden_dim = params["w1"].shape
    state_dim = in_dim - encode_dim
    action_dim = params["wm"].shape[-1]
    two_a = 2 * action_dim
    assert encode_dim <= _LANES and hidden_dim <= _LANES and two_a <= _LANES, (
        "single-128-lane slab scheme requires encode_dim, hidden_dim, 2*action_dim <= 128")

    g_pad = _round_up(gmm_dim, _ROW_ALIGN)
    s_pad = _round_up(state_dim, _ROW_ALIGN)

    def pad2(x, rows, cols):
        x = jnp.asarray(x, jnp.float32)
        return jnp.pad(x, ((0, rows - x.shape[0]), (0, cols - x.shape[1])))

    w1 = params["w1"]
    w_head = jnp.concatenate([params["wm"], params["wl"]], axis=-1)           # (hidden, 2A)
    b_head = jnp.concatenate([params["bm"].reshape(1, -1),
                              params["bl"].reshape(1, -1)], axis=-1)          # (1, 2A)

    w_slab = jnp.concatenate([
        pad2(params["w_enc"], g_pad, _LANES),        # W_enc
        pad2(w1[:state_dim, :], s_pad, _LANES),      # W1 (state half)
        pad2(w1[state_dim:, :], _LANES, _LANES),     # W1 (encoded-gmm half)
        pad2(params["w2"], _LANES, _LANES),          # W2
        pad2(w_head, _LANES, _LANES),                # [Wm | Wl]
    ], axis=0)                                       # (g_pad + s_pad + 384, 128)
    w_slab = w_slab.astype(jnp.bfloat16 if use_bf16 else jnp.float32)

    b_slab = jnp.concatenate([
        pad2(params["b_enc"].reshape(1, -1), 1, _LANES),
        pad2(params["b1"].reshape(1, -1), 1, _LANES),
        pad2(params["b2"].reshape(1, -1), 1, _LANES),
        pad2(b_head, 1, _LANES),
    ], axis=0)
    b_slab = jnp.pad(b_slab, ((0, 4), (0, 0)))       # (8, 128) f32 (biases stay f32)

    return w_slab, b_slab, dict(action_dim=int(action_dim))


@functools.partial(jax.jit, static_argnames=("action_dim",))
def policy_forward(state, gmm, w_slab, b_slab, *, action_dim):
    """Runs PolicyNetwork.forward on pre-packed slabs. Returns (mean, log_std)."""
    B, state_dim = state.shape
    gmm_dim = gmm.shape[-1]
    two_a = 2 * action_dim

    s_pad = _round_up(state_dim, _ROW_ALIGN)
    g_pad = _round_up(gmm_dim, _ROW_ALIGN)
    assert w_slab.shape == (g_pad + s_pad + 3 * _LANES, _LANES), "slab/input shape mismatch"
    assert b_slab.shape == (8, _LANES)

    TB, B_pad = _choose_batch_tiling(B)
    grid = (B_pad // TB,)

    def pad_input(x, rows, cols):
        x = x.astype(jnp.float32)
        if x.shape == (rows, cols):
            return x                      # skip the extra HBM copy when no padding needed
        return jnp.pad(x, ((0, rows - x.shape[0]), (0, cols - x.shape[1])))

    state_p = pad_input(state, B_pad, s_pad)
    gmm_p = pad_input(gmm, B_pad, g_pad)

    kernel = _make_kernel(g_pad, s_pad, action_dim, w_slab.dtype)

    flops = 2 * B_pad * (g_pad * _LANES + s_pad * _LANES + 3 * _LANES * _LANES)
    bytes_accessed = (state_p.size * 4 + gmm_p.size * 4
                      + w_slab.size * w_slab.dtype.itemsize
                      + b_slab.size * 4 + B_pad * _LANES * 4)

    fused = pl.pallas_call(
        kernel,
        out_shape=jax.ShapeDtypeStruct((B_pad, _LANES), jnp.float32),
        grid=grid,
        in_specs=[
            pl.BlockSpec((TB, s_pad), lambda i: (i, 0)),
            pl.BlockSpec((TB, g_pad), lambda i: (i, 0)),
            pl.BlockSpec(w_slab.shape, lambda i: (0, 0)),   # weights stay VMEM-resident
            pl.BlockSpec(b_slab.shape, lambda i: (0, 0)),   # biases stay VMEM-resident
        ],
        out_specs=pl.BlockSpec((TB, _LANES), lambda i: (i, 0)),  # lane-dense output block
        compiler_params=pltpu.CompilerParams(
            dimension_semantics=("parallel",),
            vmem_limit_bytes=32 * 1024 * 1024,
        ),
        cost_estimate=pl.CostEstimate(
            flops=flops, transcendentals=0, bytes_accessed=bytes_accessed),
    )(state_p, gmm_p, w_slab, b_slab)

    mean = fused[:B, :action_dim]
    log_std = fused[:B, action_dim:two_a]
    return mean, log_std


def init_params(key, state_dim, gmm_dim, action_dim, encode_dim=8, hidden_dim=32):
    """Deterministic synthetic parameter init (weights stored as (in, out))."""
    ks = jax.random.split(key, 10)
    in_dim = state_dim + encode_dim

    def lin(kw, kb, fan_in, fan_out):
        bound = 1.0 / jnp.sqrt(jnp.float32(fan_in))
        w = jax.random.uniform(kw, (fan_in, fan_out), jnp.float32, -bound, bound)
        b = jax.random.uniform(kb, (1, fan_out), jnp.float32, -bound, bound)
        return w, b

    w_enc, b_enc = lin(ks[0], ks[1], gmm_dim, encode_dim)
    w1, b1 = lin(ks[2], ks[3], in_dim, hidden_dim)
    w2, b2 = lin(ks[4], ks[5], hidden_dim, hidden_dim)
    wm, bm = lin(ks[6], ks[7], hidden_dim, action_dim)
    wl, bl = lin(ks[8], ks[9], hidden_dim, action_dim)
    return dict(w_enc=w_enc, b_enc=b_enc, w1=w1, b1=b1, w2=w2, b2=b2,
                wm=wm, bm=bm, wl=wl, bl=bl)


def reference_forward(state, gmm, params):
    enc = jax.nn.relu(gmm @ params["w_enc"] + params["b_enc"])
    x = jnp.concatenate([state, enc], axis=-1)
    h1 = jax.nn.relu(x @ params["w1"] + params["b1"])
    h2 = jax.nn.relu(h1 @ params["w2"] + params["b2"])
    mean = h2 @ params["wm"] + params["bm"]
    log_std = jnp.clip(h2 @ params["wl"] + params["bl"], LOG_SIG_MIN, LOG_SIG_MAX)
    return mean, log_std


if __name__ == "__main__":
    B, STATE_DIM, GMM_DIM, ACTION_DIM, ENCODE_DIM, HIDDEN = 8, 16, 12, 4, 8, 32

    key = jax.random.PRNGKey(0)
    k_state, k_gmm, k_params, k_big = jax.random.split(key, 4)

    state = jax.random.normal(k_state, (B, STATE_DIM), jnp.float32)
    gmm = jax.random.normal(k_gmm, (B, GMM_DIM), jnp.float32)
    params = init_params(k_params, STATE_DIM, GMM_DIM, ACTION_DIM,
                         encode_dim=ENCODE_DIM, hidden_dim=HIDDEN)
    ref_mean, ref_log_std = reference_forward(state, gmm, params)

    # f32 slab: exact parity with the reference.
    w32, b32, meta = pack_policy_params(params, use_bf16=False)
    mean, log_std = policy_forward(state, gmm, w32, b32, **meta)
    jax.block_until_ready((mean, log_std))
    assert mean.shape == (B, ACTION_DIM) and log_std.shape == (B, ACTION_DIM)
    assert jnp.allclose(mean, ref_mean, atol=1e-4, rtol=1e-4)
    assert jnp.allclose(log_std, ref_log_std, atol=1e-4, rtol=1e-4)

    # bf16 slab (default fast path): bf16 MXU operands, f32 accumulation -> looser tolerance.
    wbf, bbf, meta = pack_policy_params(params, use_bf16=True)
    mean_bf, log_std_bf = policy_forward(state, gmm, wbf, bbf, **meta)
    jax.block_until_ready((mean_bf, log_std_bf))
    assert jnp.allclose(mean_bf, ref_mean, atol=5e-2, rtol=5e-2)
    assert jnp.allclose(log_std_bf, ref_log_std, atol=5e-2, rtol=5e-2)

    # multi-tile batch: exercises grid > 1 (the path that feeds both v7x TensorCores).
    BIG_B = 1040
    kb1, kb2 = jax.random.split(k_big)
    state_big = jax.random.normal(kb1, (BIG_B, STATE_DIM), jnp.float32)
    gmm_big = jax.random.normal(kb2, (BIG_B, GMM_DIM), jnp.float32)
    mean_big, log_std_big = policy_forward(state_big, gmm_big, wbf, bbf, **meta)
    jax.block_until_ready((mean_big, log_std_big))
    ref_mb, ref_lb = reference_forward(state_big, gmm_big, params)
    assert mean_big.shape == (BIG_B, ACTION_DIM)
    assert jnp.allclose(mean_big, ref_mb, atol=5e-2, rtol=5e-2)
    assert jnp.allclose(log_std_big, ref_lb, atol=5e-2, rtol=5e-2)

    print("KERNEL_OK")
</pallas_src>

<mosaic_0001>
module attributes {stable_mosaic.version = 11 : i64} {
  func.func @kernel(%arg0: i32, %arg1: memref<8x16xf32, #tpu.memory_space<vmem>>, %arg2: memref<8x16xf32, #tpu.memory_space<vmem>>, %arg3: memref<416x128xf32, #tpu.memory_space<vmem>>, %arg4: memref<8x128xf32, #tpu.memory_space<vmem>>, %arg5: memref<8x128xf32, #tpu.memory_space<vmem>>) attributes {dimension_semantics = [#tpu.dimension_semantics<parallel>], iteration_bounds = array<i64: 1>, scalar_prefetch = 0 : i64, scratch_operands = 0 : i64, tpu.core_type = #tpu.core_type<tc>, window_params = [{transform_indices = @transform_0, window_bounds = array<i64: 8, 16>}, {transform_indices = @transform_1, window_bounds = array<i64: 8, 16>}, {pipeline_mode = #tpu.pipeline_mode<synchronous>, transform_indices = @transform_2, window_bounds = array<i64: 416, 128>}, {pipeline_mode = #tpu.pipeline_mode<synchronous>, transform_indices = @transform_3, window_bounds = array<i64: 8, 128>}, {transform_indices = @transform_4, window_bounds = array<i64: 8, 128>}]} {
    %c0 = arith.constant 0 : index
    %c0_0 = arith.constant 0 : index
    %0 = vector.load %arg1[%c0, %c0_0] : memref<8x16xf32, #tpu.memory_space<vmem>>, vector<8x16xf32>
    %c0_1 = arith.constant 0 : index
    %c0_2 = arith.constant 0 : index
    %1 = vector.load %arg2[%c0_1, %c0_2] : memref<8x16xf32, #tpu.memory_space<vmem>>, vector<8x16xf32>
    %c0_3 = arith.constant 0 : index
    %c0_4 = arith.constant 0 : index
    %2 = vector.load %arg3[%c0_3, %c0_4] : memref<416x128xf32, #tpu.memory_space<vmem>>, vector<16x128xf32>
    %cst = arith.constant dense<0.000000e+00> : vector<8x128xf32>
    %3 = tpu.matmul %1, %2, %cst {dimension_numbers = #tpu.dot_dimension_numbers<[1], [0], [0], [1], [0, 0, 1, 1], [], []>} : vector<8x16xf32>, vector<16x128xf32>, vector<8x128xf32> -> vector<8x128xf32>
    %c0_5 = arith.constant 0 : index
    %c0_6 = arith.constant 0 : index
    %4 = vector.load %arg4[%c0_5, %c0_6] : memref<8x128xf32, #tpu.memory_space<vmem>>, vector<1x128xf32>
    %5 = vector.broadcast %4 : vector<1x128xf32> to vector<8x128xf32>
    %6 = arith.addf %3, %5 : vector<8x128xf32>
    %cst_7 = arith.constant 0.000000e+00 : f32
    %7 = vector.broadcast %cst_7 : f32 to vector<8x128xf32>
    %8 = arith.maximumf %6, %7 : vector<8x128xf32>
    %c16 = arith.constant 16 : index
    %c0_8 = arith.constant 0 : index
    %9 = vector.load %arg3[%c16, %c0_8] : memref<416x128xf32, #tpu.memory_space<vmem>>, vector<16x128xf32>
    %cst_9 = arith.constant dense<0.000000e+00> : vector<8x128xf32>
    %10 = tpu.matmul %0, %9, %cst_9 {dimension_numbers = #tpu.dot_dimension_numbers<[1], [0], [0], [1], [0, 0, 1, 1], [], []>} : vector<8x16xf32>, vector<16x128xf32>, vector<8x128xf32> -> vector<8x128xf32>
    %c32 = arith.constant 32 : index
    %c0_10 = arith.constant 0 : index
    %11 = vector.load %arg3[%c32, %c0_10] : memref<416x128xf32, #tpu.memory_space<vmem>>, vector<128x128xf32>
    %cst_11 = arith.constant dense<0.000000e+00> : vector<8x128xf32>
    %12 = tpu.matmul %8, %11, %cst_11 {dimension_numbers = #tpu.dot_dimension_numbers<[1], [0], [0], [1], [0, 0, 1, 1], [], []>} : vector<8x128xf32>, vector<128x128xf32>, vector<8x128xf32> -> vector<8x128xf32>
    %13 = arith.addf %10, %12 : vector<8x128xf32>
    %c1 = arith.constant 1 : index
    %c0_12 = arith.constant 0 : index
    %14 = vector.load %arg4[%c1, %c0_12] : memref<8x128xf32, #tpu.memory_space<vmem>>, vector<1x128xf32>
    %15 = vector.broadcast %14 : vector<1x128xf32> to vector<8x128xf32>
    %16 = arith.addf %13, %15 : vector<8x128xf32>
    %cst_13 = arith.constant 0.000000e+00 : f32
    %17 = vector.broadcast %cst_13 : f32 to vector<8x128xf32>
    %18 = arith.maximumf %16, %17 : vector<8x128xf32>
    %c160 = arith.constant 160 : index
    %c0_14 = arith.constant 0 : index
    %19 = vector.load %arg3[%c160, %c0_14] : memref<416x128xf32, #tpu.memory_space<vmem>>, vector<128x128xf32>
    %cst_15 = arith.constant dense<0.000000e+00> : vector<8x128xf32>
    %20 = tpu.matmul %18, %19, %cst_15 {dimension_numbers = #tpu.dot_dimension_numbers<[1], [0], [0], [1], [0, 0, 1, 1], [], []>} : vector<8x128xf32>, vector<128x128xf32>, vector<8x128xf32> -> vector<8x128xf32>
    %c2 = arith.constant 2 : index
    %c0_16 = arith.constant 0 : index
    %21 = vector.load %arg4[%c2, %c0_16] : memref<8x128xf32, #tpu.memory_space<vmem>>, vector<1x128xf32>
    %22 = vector.broadcast %21 : vector<1x128xf32> to vector<8x128xf32>
    %23 = arith.addf %20, %22 : vector<8x128xf32>
    %cst_17 = arith.constant 0.000000e+00 : f32
    %24 = vector.broadcast %cst_17 : f32 to vector<8x128xf32>
    %25 = arith.maximumf %23, %24 : vector<8x128xf32>
    %c288 = arith.constant 288 : index
    %c0_18 = arith.constant 0 : index
    %26 = vector.load %arg3[%c288, %c0_18] : memref<416x128xf32, #tpu.memory_space<vmem>>, vector<128x128xf32>
    %cst_19 = arith.constant dense<0.000000e+00> : vector<8x128xf32>
    %27 = tpu.matmul %25, %26, %cst_19 {dimension_numbers = #tpu.dot_dimension_numbers<[1], [0], [0], [1], [0, 0, 1, 1], [], []>} : vector<8x128xf32>, vector<128x128xf32>, vector<8x128xf32> -> vector<8x128xf32>
    %c3 = arith.constant 3 : index
    %c0_20 = arith.constant 0 : index
    %28 = vector.load %arg4[%c3, %c0_20] : memref<8x128xf32, #tpu.memory_space<vmem>>, vector<1x128xf32>
    %29 = vector.broadcast %28 : vector<1x128xf32> to vector<8x128xf32>
    %30 = arith.addf %27, %29 : vector<8x128xf32>
    %31 = tpu.iota {dimensions = array<i32: 1>} : vector<8x128xi32>
    %c4_i32 = arith.constant 4 : i32
    %32 = vector.broadcast %c4_i32 : i32 to vector<8x128xi32>
    %33 = arith.cmpi sge, %31, %32 : vector<8x128xi32>
    %c8_i32 = arith.constant 8 : i32
    %34 = vector.broadcast %c8_i32 : i32 to vector<8x128xi32>
    %35 = arith.cmpi slt, %31, %34 : vector<8x128xi32>
    %36 = arith.andi %33, %35 : vector<8x128xi1>
    %cst_21 = arith.constant -2.000000e+01 : f32
    %cst_22 = arith.constant 2.000000e+00 : f32
    %37 = vector.broadcast %cst_21 : f32 to vector<8x128xf32>
    %38 = arith.maximumf %37, %30 : vector<8x128xf32>
    %39 = vector.broadcast %cst_22 : f32 to vector<8x128xf32>
    %40 = arith.minimumf %39, %38 : vector<8x128xf32>
    %41 = arith.select %36, %40, %30 : vector<8x128xi1>, vector<8x128xf32>
    %c0_23 = arith.constant 0 : index
    %c0_24 = arith.constant 0 : index
    %42 = vector.load %arg5[%c0_23, %c0_24] : memref<8x128xf32, #tpu.memory_space<vmem>>, vector<8x128xf32>
    tpu.vector_store %arg5[%c0_23, %c0_24], %41 {strides = array<i32>} : memref<8x128xf32, #tpu.memory_space<vmem>>, vector<8x128xf32>,
    return
  }
  func.func @transform_0(%arg0: i32) -> (i32, i32) {
    %c0_i32 = arith.constant 0 : i32
    %c0_i32_0 = arith.constant 0 : i32
    return %arg0, %c0_i32 : i32, i32
  }
  func.func @transform_1(%arg0: i32) -> (i32, i32) {
    %c0_i32 = arith.constant 0 : i32
    %c0_i32_0 = arith.constant 0 : i32
    return %arg0, %c0_i32 : i32, i32
  }
  func.func @transform_2(%arg0: i32) -> (i32, i32) {
    %c0_i32 = arith.constant 0 : i32
    %c0_i32_0 = arith.constant 0 : i32
    %c0_i32_1 = arith.constant 0 : i32
    return %c0_i32, %c0_i32_0 : i32, i32
  }
  func.func @transform_3(%arg0: i32) -> (i32, i32) {
    %c0_i32 = arith.constant 0 : i32
    %c0_i32_0 = arith.constant 0 : i32
    %c0_i32_1 = arith.constant 0 : i32
    return %c0_i32, %c0_i32_0 : i32, i32
  }
  func.func @transform_4(%arg0: i32) -> (i32, i32) {
    %c0_i32 = arith.constant 0 : i32
    %c0_i32_0 = arith.constant 0 : i32
    return %arg0, %c0_i32 : i32, i32
  }
}

</mosaic_0001>

<bundles_post_ra>
// kernel: policy_forward.1
= control target key start
LH: loop header
LB: loop body
LE: loop exit
PB: predicated region body
PF: predicated region fallthrough
CT: control target
= control target key end

     0   :  { %9 = vsyncpa [#allocation3], 0  ;;  %s689_s15 = smov [#allocation2]   ;;  %s807_s0 = inlined_call_operand.vmem [shape: f32[8,16], index: 0, kind: input, shape index: {}]   ;;  %s808_s1 = inlined_call_operand.vmem [shape: f32[8,16], index: 1, kind: input, shape index: {}]   ;;  %s809_s2 = inlined_call_operand.hbm [shape: f32[416,128], index: 2, kind: input, shape index: {}]   ;;  %s810_s3 = inlined_call_operand.vmem [shape: f32[8,128], index: 3, kind: input, shape index: {}]   ;;  %s811_s4 = inlined_call_operand.vmem [shape: f32[8,128], index: 4, kind: output, shape index: {}]  }
   0x1   :  { %s19_s16 = sshll.u32 %s689_s15, 4  ;;  %s20_s16 = int_to_ptr.vmem [resolvable:$true] %s19_s16 }
   0x2   :  { %s675_s17 = scalar_lea.vmem %s20_s16, 6656  ;;  %p680_p1 = scmp.lt.s32.totalorder %s20_s16, %s20_s16 }
   0x3   :  { %p676_p0 = scmp.ne.s32.totalorder %s20_s16, %s675_s17  ;;  %p681_p2 = scmp.lt.s32.totalorder %s675_s17, %s675_s17 }
   0x5   :  { %p682_p3 = por %p681_p2, %p680_p1 }
   0x7   :  { %p683_p4 = pnand %p682_p3, %p676_p0 }
   0x9   :  { %686 = shalt.err (!%p683_p4)
}
   0xa   :  { %s690_s18 = smov 128   ;;  %s691_s19 = smov 8  }
   0xb   :  { %25 = dma.hbm_to_vmem [thread:$0]  %s809_s2, 6656, %s20_s16, [#allocation3], %s690_s18, %s690_s18, %s691_s19  }
   0xc   :  { %687 = dma.done.wait [#allocation3], 6656  }
   0xd   :  { %688 = vsyncadd [#allocation3], 4294960640  ;;  %v692_v0 = vmov 0.0   ;;  %vm693_vm0 = vmmov 0   ;;  %v34_v1 = vld [vmem:[#allocation2 + $0x8] sm:$0xff]  ;;  %v33_v2 = vld [vmem:[#allocation2] sm:$0xff] }
   0xe   :  { %543 = vmatprep.subr.mxu0 %v692_v0  ;;  %547 = vmatprep.mubr.msk.f32.mxu0 %vm693_vm0, %v692_v0  ;;  %v32_v3 = vld [vmem:[%s808_s1] sm:$0xff]  ;;  %vm40_vm1 = vcmask 130048   ;;  %v132_v4 = vld [vmem:[#allocation2 + $0x98] sm:$0xff]  ;;  %v131_v5 = vld [vmem:[#allocation2 + $0x90] sm:$0xff] }
   0xf   :  { %550 = vmatprep.subr.mxu1 %v692_v0  ;;  %582 = vmatprep.mubr.msk.f32.mxu1 %vm693_vm0, %v692_v0  ;;  %v130_v6 = vld [vmem:[#allocation2 + $0x88] sm:$0xff]  ;;  %v129_v7 = vld [vmem:[#allocation2 + $0x80] sm:$0xff]  ;;  %v128_v8 = vld [vmem:[#allocation2 + $0x78] sm:$0xff] }
  0x10   :  { %544 = vmatpush3.msra.mxu0 %v34_v1  ;;  %551 = vmatpush3.msra.mxu1 %v132_v4  ;;  %v127_v9 = vld [vmem:[#allocation2 + $0x70] sm:$0xff]  ;;  %v126_v10 = vld [vmem:[#allocation2 + $0x68] sm:$0xff]  ;;  %v125_v11 = vld [vmem:[#allocation2 + $0x60] sm:$0xff] }
  0x11   :  { %545 = vmatprep.subr.mxu0 %v692_v0  ;;  %552 = vmatprep.subr.mxu1 %v692_v0  ;;  %v124_v12 = vld [vmem:[#allocation2 + $0x58] sm:$0xff]  ;;  %v123_v13 = vld [vmem:[#allocation2 + $0x50] sm:$0xff]  ;;  %v122_v14 = vld [vmem:[#allocation2 + $0x48] sm:$0xff] }
  0x12   :  { %546 = vmatpush3.msra.mxu0 %v33_v2  ;;  %553 = vmatpush3.msra.mxu1 %v131_v5  ;;  %v121_v15 = vld [vmem:[#allocation2 + $0x40] sm:$0xff]  ;;  %v120_v16 = vld [vmem:[#allocation2 + $0x38] sm:$0xff]  ;;  %v119_v17 = vld [vmem:[#allocation2 + $0x30] sm:$0xff] }
  0x13   :  { %548 = vmatmul.mubr.msk.f32.vlgmr.msra.gmra.mxu0 %vm40_vm1, %v32_v3  ;;  %554 = vmatprep.subr.mxu1 %v692_v0  ;;  %v116_v18 = vld [vmem:[#allocation2 + $0x18] sm:$0xff]  ;;  %v118_v19 = vld [vmem:[#allocation2 + $0x28] sm:$0xff]  ;;  %v115_v20 = vld [vmem:[#allocation2 + $0x10] sm:$0xff] }
  0x14   :  { %585 = vmatprep.subr.mxu0 %v692_v0  ;;  %555 = vmatpush3.msra.mxu1 %v130_v6  ;;  %v31_v21 = vld [vmem:[%s807_s0] sm:$0xff]  ;;  %v298_v23 = vld [vmem:[#allocation2 + $0x118] sm:$0xff]  ;;  %v297_v24 = vld [vmem:[#allocation2 + $0x110] sm:$0xff] }
  0x15   :  { %589 = vmatprep.mubr.msk.f32.mxu0 %vm693_vm0, %v692_v0  ;;  %556 = vmatprep.subr.mxu1 %v692_v0  ;;  %v117_v22 = vld [vmem:[#allocation2 + $0x20] sm:$0xff]  ;;  %v296_v25 = vld [vmem:[#allocation2 + $0x108] sm:$0xff]  ;;  %v294_v27 = vld [vmem:[#allocation2 + $0xf8] sm:$0xff] }
  0x16   :  { %557 = vmatpush3.msra.mxu1 %v129_v7  ;;  %586 = vmatpush3.msra.mxu0 %v116_v18  ;;  %v295_v26 = vld [vmem:[#allocation2 + $0x100] sm:$0xff]  ;;  %v293_v28 = vld [vmem:[#allocation2 + $0xf0] sm:$0xff]  ;;  %v292_v29 = vld [vmem:[#allocation2 + $0xe8] sm:$0xff] }
  0x17   :  { %558 = vmatprep.subr.mxu1 %v692_v0  ;;  %587 = vmatprep.subr.mxu0 %v692_v0  ;;  %v291_v30 = vld [vmem:[#allocation2 + $0xe0] sm:$0xff]  ;;  %v290_v31 = vld [vmem:[#allocation2 + $0xd8] sm:$0xff]  ;;  %v289_v32 = vld [vmem:[#allocation2 + $0xd0] sm:$0xff] }
  0x18   :  { %559 = vmatpush3.msra.mxu1 %v128_v8  ;;  %588 = vmatpush3.msra.mxu0 %v115_v20  ;;  %v288_v33 = vld [vmem:[#allocation2 + $0xc8] sm:$0xff]  ;;  %v287_v34 = vld [vmem:[#allocation2 + $0xc0] sm:$0xff]  ;;  %v286_v41 = vld [vmem:[#allocation2 + $0xb8] sm:$0xff] }
  0x19   :  { %560 = vmatprep.subr.mxu1 %v692_v0  ;;  %590 = vmatmul.mubr.msk.f32.vlgmr.msra.gmra.mxu0 %vm40_vm1, %v31_v21  ;;  %v480_v35 = vld [vmem:[%s810_s3] ss:$0 sm:$0xff]  ;;  %v285_v43 = vld [vmem:[#allocation2 + $0xb0] sm:$0xff]  ;;  %v284_v44 = vld [vmem:[#allocation2 + $0xa8] sm:$0xff] }
  0x1a   :  { %561 = vmatpush3.msra.mxu1 %v127_v9  ;;  %592 = vmatprep.subr.mxu0 %v692_v0  ;;  %v283_v45 = vld [vmem:[#allocation2 + $0xa0] sm:$0xff]  ;;  %v390_v46 = vld [vmem:[#allocation2 + $0x198] sm:$0xff]  ;;  %v389_v47 = vld [vmem:[#allocation2 + $0x190] sm:$0xff] }
  0x1b   :  { %562 = vmatprep.subr.mxu1 %v692_v0  ;;  %624 = vmatprep.mubr.msk.f32.mxu0 %vm693_vm0, %v692_v0  ;;  %v388_v48 = vld [vmem:[#allocation2 + $0x188] sm:$0xff]  ;;  %v387_v49 = vld [vmem:[#allocation2 + $0x180] sm:$0xff]  ;;  %v386_v50 = vld [vmem:[#allocation2 + $0x178] sm:$0xff] }
  0x1c   :  { %563 = vmatpush3.msra.mxu1 %v126_v10  ;;  %593 = vmatpush3.msra.mxu0 %v298_v23  ;;  %v385_v51 = vld [vmem:[#allocation2 + $0x170] sm:$0xff]  ;;  %v384_v52 = vld [vmem:[#allocation2 + $0x168] sm:$0xff]  ;;  %v383_v53 = vld [vmem:[#allocation2 + $0x160] sm:$0xff]  ;;  %v466_v10 = vlaneseq }
  0x1d   :  { %564 = vmatprep.subr.mxu1 %v692_v0  ;;  %594 = vmatprep.subr.mxu0 %v692_v0  ;;  %v382_v54 = vld [vmem:[#allocation2 + $0x158] sm:$0xff]  ;;  %v381_v55 = vld [vmem:[#allocation2 + $0x150] sm:$0xff]  ;;  %v380_v56 = vld [vmem:[#allocation2 + $0x148] sm:$0xff] }
  0x1e   :  { %565 = vmatpush3.msra.mxu1 %v125_v11  ;;  %595 = vmatpush3.msra.mxu0 %v297_v24  ;;  %v379_v57 = vld [vmem:[#allocation2 + $0x140] sm:$0xff]  ;;  %v378_v58 = vld [vmem:[#allocation2 + $0x138] sm:$0xff]  ;;  %v377_v2 = vld [vmem:[#allocation2 + $0x130] sm:$0xff]  ;;  %v467_v11 = vand.u32 127, %v466_v10 }
  0x1f   :  { %566 = vmatprep.subr.mxu1 %v692_v0  ;;  %596 = vmatprep.subr.mxu0 %v692_v0  ;;  %v483_v60 = vld [vmem:[%s810_s3 + $0x1] ss:$0 sm:$0xff]  ;;  %v376_v3 = vld [vmem:[#allocation2 + $0x128] sm:$0xff]  ;;  %v484_v5 = vld [vmem:[%s810_s3 + $0x2] ss:$0 sm:$0xff] }
  0x20   :  { %567 = vmatpush3.msra.mxu1 %v124_v12  ;;  %597 = vmatpush3.msra.mxu0 %v296_v25  ;;  %v375_v4 = vld [vmem:[#allocation2 + $0x120] sm:$0xff]  ;;  %vm468_vm2 = vcmp.ge.s32.totalorder %v467_v11, 4  ;;  %vm469_vm3 = vcmp.lt.s32.totalorder %v467_v11, 8 }
  0x21   :  { %568 = vmatprep.subr.mxu1 %v692_v0  ;;  %598 = vmatprep.subr.mxu0 %v692_v0  ;;  %v485_v12 = vld [vmem:[%s810_s3 + $0x3] ss:$0 sm:$0xff]  ;;  %vm470_vm4 = vmand %vm468_vm2, %vm469_vm3 }
  0x22   :  { %569 = vmatpush3.msra.mxu1 %v123_v13  ;;  %599 = vmatpush3.msra.mxu0 %v295_v26 }
  0x23   :  { %570 = vmatprep.subr.mxu1 %v692_v0  ;;  %600 = vmatprep.subr.mxu0 %v692_v0 }
  0x24   :  { %571 = vmatpush3.msra.mxu1 %v122_v14  ;;  %601 = vmatpush3.msra.mxu0 %v294_v27 }
  0x25   :  { %572 = vmatprep.subr.mxu1 %v692_v0  ;;  %602 = vmatprep.subr.mxu0 %v692_v0 }
  0x26   :  { %573 = vmatpush3.msra.mxu1 %v121_v15  ;;  %603 = vmatpush3.msra.mxu0 %v293_v28 }
  0x27   :  { %574 = vmatprep.subr.mxu1 %v692_v0  ;;  %604 = vmatprep.subr.mxu0 %v692_v0 }
  0x28   :  { %575 = vmatpush3.msra.mxu1 %v120_v16  ;;  %605 = vmatpush3.msra.mxu0 %v292_v29 }
  0x29   :  { %576 = vmatprep.subr.mxu1 %v692_v0  ;;  %606 = vmatprep.subr.mxu0 %v692_v0 }
  0x2a   :  { %577 = vmatpush3.msra.mxu1 %v119_v17  ;;  %607 = vmatpush3.msra.mxu0 %v291_v30 }
  0x2b   :  { %578 = vmatprep.subr.mxu1 %v692_v0  ;;  %608 = vmatprep.subr.mxu0 %v692_v0 }
  0x2c   :  { %579 = vmatpush3.msra.mxu1 %v118_v19  ;;  %609 = vmatpush3.msra.mxu0 %v290_v31 }
  0x2d   :  { %580 = vmatprep.subr.mxu1 %v692_v0  ;;  %610 = vmatprep.subr.mxu0 %v692_v0 }
  0x2e   :  { %581 = vmatpush3.msra.mxu1 %v117_v22  ;;  %611 = vmatpush3.msra.mxu0 %v289_v32 }
  0x2f   :  { %627 = vmatprep.subr.mxu1 %v692_v0  ;;  %612 = vmatprep.subr.mxu0 %v692_v0 }
  0x30   :  { %613 = vmatpush3.msra.mxu0 %v288_v33 }
  0x31   :  { %614 = vmatprep.subr.mxu0 %v692_v0 }
  0x32   :  { %615 = vmatpush3.msra.mxu0 %v287_v34 }
  0x33   :  { %616 = vmatprep.subr.mxu0 %v692_v0 }
  0x34   :  { %617 = vmatpush3.msra.mxu0 %v286_v41 }
  0x35   :  { %618 = vmatprep.subr.mxu0 %v692_v0 }
  0x36   :  { %619 = vmatpush3.msra.mxu0 %v285_v43 }
  0x37   :  { %620 = vmatprep.subr.mxu0 %v692_v0 }
  0x38   :  { %621 = vmatpush3.msra.mxu0 %v284_v44 }
  0x39   :  { %622 = vmatprep.subr.mxu0 %v692_v0 }
  0x3a   :  { %623 = vmatpush3.msra.mxu0 %v283_v45 }
  0xd3   :  { %v110_v36 = vpop.f32.mrf.mxu0 }
  0xd4   :  { %v111_v37 = vadd.f32 %v480_v35, %v110_v36 }
  0xd5   :  { %v549_v38 = vpop.f32.mrf.mxu0 }
  0xd6   :  { %v114_v39 = vmax.f32 %v111_v37, 0.0 }
  0xd8   :  { %583 = vmatmul.mubr.f32.vlgmr.msra.gmra.mxu1 %v114_v39 }
  0xd9   :  { %659 = vmatprep.mubr.msk.f32.mxu1 %vm693_vm0, %v692_v0  ;;  %v272_v40 = vpop.f32.mrf.mxu0  ;;  %628 = vmatpush3.msra.mxu1 %v390_v46 }
  0xda   :  { %629 = vmatprep.subr.mxu1 %v692_v0 }
  0xdb   :  { %v591_v42 = vpop.f32.mrf.mxu0  ;;  %630 = vmatpush3.msra.mxu1 %v389_v47 }
  0xdc   :  { %631 = vmatprep.subr.mxu1 %v692_v0 }
  0xdd   :  { %632 = vmatpush3.msra.mxu1 %v388_v48 }
  0xde   :  { %633 = vmatprep.subr.mxu1 %v692_v0 }
  0xdf   :  { %634 = vmatpush3.msra.mxu1 %v387_v49 }
  0xe0   :  { %635 = vmatprep.subr.mxu1 %v692_v0 }
  0xe1   :  { %636 = vmatpush3.msra.mxu1 %v386_v50 }
  0xe2   :  { %637 = vmatprep.subr.mxu1 %v692_v0 }
  0xe3   :  { %638 = vmatpush3.msra.mxu1 %v385_v51 }
  0xe4   :  { %639 = vmatprep.subr.mxu1 %v692_v0 }
  0xe5   :  { %640 = vmatpush3.msra.mxu1 %v384_v52 }
  0xe6   :  { %641 = vmatprep.subr.mxu1 %v692_v0 }
  0xe7   :  { %642 = vmatpush3.msra.mxu1 %v383_v53 }
  0xe8   :  { %643 = vmatprep.subr.mxu1 %v692_v0 }
  0xe9   :  { %644 = vmatpush3.msra.mxu1 %v382_v54 }
  0xea   :  { %645 = vmatprep.subr.mxu1 %v692_v0 }
  0xeb   :  { %646 = vmatpush3.msra.mxu1 %v381_v55 }
  0xec   :  { %647 = vmatprep.subr.mxu1 %v692_v0 }
  0xed   :  { %648 = vmatpush3.msra.mxu1 %v380_v56 }
  0xee   :  { %649 = vmatprep.subr.mxu1 %v692_v0 }
  0xef   :  { %650 = vmatpush3.msra.mxu1 %v379_v57 }
  0xf0   :  { %651 = vmatprep.subr.mxu1 %v692_v0 }
  0xf1   :  { %652 = vmatpush3.msra.mxu1 %v378_v58 }
  0xf2   :  { %653 = vmatprep.subr.mxu1 %v692_v0 }
  0xf3   :  { %654 = vmatpush3.msra.mxu1 %v377_v2 }
  0xf4   :  { %655 = vmatprep.subr.mxu1 %v692_v0 }
  0xf5   :  { %656 = vmatpush3.msra.mxu1 %v376_v3 }
  0xf6   :  { %657 = vmatprep.subr.mxu1 %v692_v0 }
  0xf7   :  { %658 = vmatpush3.msra.mxu1 %v375_v4 }
 0x198   :  { %v199_v59 = vpop.f32.mrf.mxu1 }
 0x199   :  { %v273_v61 = vadd.f32 %v272_v40, %v199_v59 }
 0x19a   :  { %v584_v62 = vpop.f32.mrf.mxu1 }
 0x19b   :  { %v281_v63 = vadd.f32 %v483_v60, %v273_v61 }
 0x19d   :  { %v282_v1 = vmax.f32 %v281_v63, 0.0 }
 0x19f   :  { %625 = vmatmul.mubr.f32.vlgmr.msra.gmra.mxu0 %v282_v1 }
 0x25f   :  { %v370_v6 = vpop.f32.mrf.mxu0 }
 0x260   :  { %v371_v7 = vadd.f32 %v484_v5, %v370_v6 }
 0x261   :  { %v626_v8 = vpop.f32.mrf.mxu0 }
 0x262   :  { %v374_v9 = vmax.f32 %v371_v7, 0.0 }
 0x264   :  { %660 = vmatmul.mubr.f32.vlgmr.msra.gmra.mxu1 %v374_v9 }
 0x324   :  { %v462_v13 = vpop.f32.mrf.mxu1 }
 0x325   :  { %v463_v14 = vadd.f32 %v485_v12, %v462_v13 }
 0x326   :  { %v661_v0 = vpop.f32.mrf.mxu1 }
 0x327   :  { %v471_v15 = vmax.f32 %v463_v14, -20.0 }
 0x329   :  { %v472_v16 = vmin.f32 %v471_v15, 2.0 }
 0x32b   :  { %v473_v17 = vsel %vm470_vm4, %v472_v16, %v463_v14 }
 0x32c   :  { %474 = vst [vmem:[%s811_s4] sm:$0xff] %v473_v17 }
 0x32d   :  { %479 = vsyncpa [#allocation3], 1 }

</bundles_post_ra>
